<compile_context>
chip_gen: v7x
topology: tpu7x:2x2x1
jax: 0.10.0
libtpu: 0.0.40
codegen_flags: <defaults>
</compile_context>

<pallas_src>
import functools

import jax
import jax.numpy as jnp
from jax import lax
from jax.experimental import pallas as pl
from jax.experimental.pallas import tpu as pltpu


def _round_up(x, m):
    return ((x + m - 1) // m) * m


def _qkv_projection_kernel(x_ref, wq_ref, wk_ref, wv_ref, q_ref, k_ref, v_ref, *, scale):
    # x_ref: (bt, d_in_p); w*_ref: (d_in_p, d_out_p); outputs: (bt, d_out_p).
    x = x_ref[...]                                   # keep native dtype for the MXU
    q = jnp.dot(x, wq_ref[...], preferred_element_type=jnp.float32)
    q_ref[...] = (q * scale).astype(q_ref.dtype)     # fold 1/sqrt(d_k) into Q once
    k_ref[...] = jnp.dot(x, wk_ref[...], preferred_element_type=jnp.float32).astype(k_ref.dtype)
    v_ref[...] = jnp.dot(x, wv_ref[...], preferred_element_type=jnp.float32).astype(v_ref.dtype)


def _flash_attention_kernel(q_ref, k_ref, v_ref, o_ref, m_ref, l_ref, acc_ref,
                            *, seq_len, block_kv, mask_kv):
    ki = pl.program_id(2)

    @pl.when(ki == 0)
    def _init():
        m_ref[...] = jnp.full_like(m_ref, -jnp.inf)
        l_ref[...] = jnp.zeros_like(l_ref)
        acc_ref[...] = jnp.zeros_like(acc_ref)

    # Scores: contract the last dim of Q and K directly (no keys.T materialization).
    s = lax.dot_general(q_ref[...], k_ref[...],
                        dimension_numbers=(((1,), (1,)), ((), ())),
                        preferred_element_type=jnp.float32)      # (bq, bkv) f32

    if mask_kv:  # static flag: only emitted when the sequence was padded
        col = ki * block_kv + lax.broadcasted_iota(jnp.int32, s.shape, 1)
        s = jnp.where(col < seq_len, s, -jnp.inf)

    m_prev = m_ref[...]
    m_new = jnp.maximum(m_prev, jnp.max(s, axis=-1, keepdims=True))
    alpha = jnp.exp(m_prev - m_new)
    p = jnp.exp(s - m_new)

    l_ref[...] = alpha * l_ref[...] + jnp.sum(p, axis=-1, keepdims=True)
    acc_ref[...] = alpha * acc_ref[...] + jnp.dot(
        p.astype(v_ref.dtype), v_ref[...], preferred_element_type=jnp.float32)
    m_ref[...] = m_new

    @pl.when(ki == pl.num_programs(2) - 1)
    def _finalize():
        inv_l = pl.reciprocal(l_ref[...], approx=True)   # EUP; avoids (bq, d) divides
        o_ref[...] = (acc_ref[...] * inv_l).astype(o_ref.dtype)


def self_attention_v1(x, w_q, w_k, w_v, *, block_seq=256):
    """SelfAttention_v1 forward. x: (B, T, d_in); weights: (d_in, d_out) -> (B, T, d_out)."""
    B, T, d_in = x.shape
    d_out = w_q.shape[1]
    scale = 1.0 / (float(d_out) ** 0.5)

    # Lane-align feature dims to 128; sequence tile is a multiple of 128, <= block_seq
    # (256 default: scores 256x256 f32 = 256 KiB, well inside scoped VMEM on all chips).
    d_in_p = _round_up(d_in, 128)
    d_out_p = _round_up(d_out, 128)
    bt = min(block_seq, _round_up(T, 128))
    t_pad = _round_up(T, bt)
    n_t = t_pad // bt
    itemsize = jnp.dtype(x.dtype).itemsize

    x_p = jnp.pad(x, ((0, 0), (0, t_pad - T), (0, d_in_p - d_in)))
    wq_p = jnp.pad(w_q, ((0, d_in_p - d_in), (0, d_out_p - d_out)))
    wk_p = jnp.pad(w_k, ((0, d_in_p - d_in), (0, d_out_p - d_out)))
    wv_p = jnp.pad(w_v, ((0, d_in_p - d_in), (0, d_out_p - d_out)))

    qkv_shape = jax.ShapeDtypeStruct((B, t_pad, d_out_p), x.dtype)
    w_spec = pl.BlockSpec((d_in_p, d_out_p), lambda b, i: (0, 0))

    # ---- Kernel 1: fused Q/K/V projection (each K/V row projected exactly once) ----
    q, k, v = pl.pallas_call(
        functools.partial(_qkv_projection_kernel, scale=scale),
        out_shape=(qkv_shape, qkv_shape, qkv_shape),
        grid=(B, n_t),
        in_specs=[
            pl.BlockSpec((None, bt, d_in_p), lambda b, i: (b, i, 0)),
            w_spec, w_spec, w_spec,
        ],
        out_specs=(
            pl.BlockSpec((None, bt, d_out_p), lambda b, i: (b, i, 0)),
            pl.BlockSpec((None, bt, d_out_p), lambda b, i: (b, i, 0)),
            pl.BlockSpec((None, bt, d_out_p), lambda b, i: (b, i, 0)),
        ),
        compiler_params=pltpu.CompilerParams(
            dimension_semantics=("parallel", "parallel")),
        cost_estimate=pl.CostEstimate(
            flops=2 * 3 * B * t_pad * d_in_p * d_out_p,
            transcendentals=0,
            bytes_accessed=(B * t_pad * d_in_p + 3 * d_in_p * d_out_p
                            + 3 * B * t_pad * d_out_p) * itemsize),
    )(x_p, wq_p, wk_p, wv_p)

    # ---- Kernel 2: flash-attention style online softmax (non-causal) ----
    out_p = pl.pallas_call(
        functools.partial(_flash_attention_kernel, seq_len=T, block_kv=bt,
                          mask_kv=(t_pad != T)),
        out_shape=jax.ShapeDtypeStruct((B, t_pad, d_out_p), x.dtype),
        grid=(B, n_t, n_t),
        in_specs=[
            pl.BlockSpec((None, bt, d_out_p), lambda b, qi, ki: (b, qi, 0)),
            pl.BlockSpec((None, bt, d_out_p), lambda b, qi, ki: (b, ki, 0)),
            pl.BlockSpec((None, bt, d_out_p), lambda b, qi, ki: (b, ki, 0)),
        ],
        out_specs=pl.BlockSpec((None, bt, d_out_p), lambda b, qi, ki: (b, qi, 0)),
        scratch_shapes=[
            pltpu.VMEM((bt, 1), jnp.float32),         # running max
            pltpu.VMEM((bt, 1), jnp.float32),         # running sum
            pltpu.VMEM((bt, d_out_p), jnp.float32),   # f32 output accumulator
        ],
        compiler_params=pltpu.CompilerParams(
            dimension_semantics=("parallel", "parallel", "arbitrary")),
        cost_estimate=pl.CostEstimate(
            flops=2 * 2 * B * t_pad * t_pad * d_out_p,
            transcendentals=B * t_pad * t_pad,
            bytes_accessed=4 * B * t_pad * d_out_p * itemsize),
    )(q, k, v)

    return out_p[:, :T, :d_out]


def self_attention_v1_ref(x, w_q, w_k, w_v):
    q = x @ w_q
    k = x @ w_k
    v = x @ w_v
    scores = q @ jnp.swapaxes(k, -1, -2)
    d_k = k.shape[-1]
    w = jax.nn.softmax(scores / (d_k ** 0.5), axis=-1)
    return w @ v


if __name__ == "__main__":
    # --- Test 1: the chapter's (6, 3) token embeddings, stacked into batch=2 ---
    inputs = jnp.array(
        [[0.43, 0.15, 0.89],
         [0.55, 0.87, 0.66],
         [0.57, 0.85, 0.64],
         [0.22, 0.58, 0.33],
         [0.77, 0.25, 0.10],
         [0.05, 0.80, 0.55]], dtype=jnp.float32)
    x = jnp.stack([inputs, inputs], axis=0)   # (2, 6, 3)

    d_in, d_out = 3, 2
    key = jax.random.PRNGKey(0)
    kq, kk, kv = jax.random.split(key, 3)
    W_q = jax.random.uniform(kq, (d_in, d_out), dtype=jnp.float32)   # torch.rand -> U[0,1)
    W_k = jax.random.uniform(kk, (d_in, d_out), dtype=jnp.float32)
    W_v = jax.random.uniform(kv, (d_in, d_out), dtype=jnp.float32)

    out = jax.block_until_ready(self_attention_v1(x, W_q, W_k, W_v))
    ref = self_attention_v1_ref(x, W_q, W_k, W_v)
    assert out.shape == (2, 6, d_out)
    assert jnp.allclose(out, ref, atol=1e-2, rtol=1e-2)

    # --- Test 2: non-aligned shapes to exercise multi-tile grid + padded-kv masking ---
    B2, T2, di2, do2 = 2, 160, 48, 80
    k1, k2, k3, k4 = jax.random.split(jax.random.PRNGKey(0), 4)
    x2 = jax.random.normal(k1, (B2, T2, di2), dtype=jnp.float32)
    Wq2 = 0.1 * jax.random.normal(k2, (di2, do2), dtype=jnp.float32)
    Wk2 = 0.1 * jax.random.normal(k3, (di2, do2), dtype=jnp.float32)
    Wv2 = 0.1 * jax.random.normal(k4, (di2, do2), dtype=jnp.float32)

    out2 = jax.block_until_ready(self_attention_v1(x2, Wq2, Wk2, Wv2, block_seq=128))
    ref2 = self_attention_v1_ref(x2, Wq2, Wk2, Wv2)
    assert out2.shape == (B2, T2, do2)
    assert jnp.allclose(out2, ref2, atol=1e-2, rtol=1e-2)

    print("KERNEL_OK")
</pallas_src>

<mosaic_0001>
module attributes {stable_mosaic.version = 11 : i64} {
  func.func @_qkv_projection_kernel(%arg0: i32, %arg1: i32, %arg2: memref<1x128x128xf32, #tpu.memory_space<vmem>>, %arg3: memref<128x128xf32, #tpu.memory_space<vmem>>, %arg4: memref<128x128xf32, #tpu.memory_space<vmem>>, %arg5: memref<128x128xf32, #tpu.memory_space<vmem>>, %arg6: memref<1x128x128xf32, #tpu.memory_space<vmem>>, %arg7: memref<1x128x128xf32, #tpu.memory_space<vmem>>, %arg8: memref<1x128x128xf32, #tpu.memory_space<vmem>>) attributes {dimension_semantics = [#tpu.dimension_semantics<parallel>, #tpu.dimension_semantics<parallel>], iteration_bounds = array<i64: 2, 1>, scalar_prefetch = 0 : i64, scratch_operands = 0 : i64, tpu.core_type = #tpu.core_type<tc>, window_params = [{transform_indices = @transform_0, window_bounds = array<i64: 1, 128, 128>}, {pipeline_mode = #tpu.pipeline_mode<synchronous>, transform_indices = @transform_1, window_bounds = array<i64: 128, 128>}, {pipeline_mode = #tpu.pipeline_mode<synchronous>, transform_indices = @transform_2, window_bounds = array<i64: 128, 128>}, {pipeline_mode = #tpu.pipeline_mode<synchronous>, transform_indices = @transform_3, window_bounds = array<i64: 128, 128>}, {transform_indices = @transform_4, window_bounds = array<i64: 1, 128, 128>}, {transform_indices = @transform_5, window_bounds = array<i64: 1, 128, 128>}, {transform_indices = @transform_6, window_bounds = array<i64: 1, 128, 128>}]} {
    %c0 = arith.constant 0 : index
    %c0_0 = arith.constant 0 : index
    %c0_1 = arith.constant 0 : index
    %0 = vector.load %arg2[%c0, %c0_0, %c0_1] : memref<1x128x128xf32, #tpu.memory_space<vmem>>, vector<1x128x128xf32>
    %1 = vector.shape_cast %0 : vector<1x128x128xf32> to vector<128x128xf32>
    %c0_2 = arith.constant 0 : index
    %c0_3 = arith.constant 0 : index
    %2 = vector.load %arg3[%c0_2, %c0_3] : memref<128x128xf32, #tpu.memory_space<vmem>>, vector<128x128xf32>
    %cst = arith.constant dense<0.000000e+00> : vector<128x128xf32>
    %3 = tpu.matmul %1, %2, %cst {dimension_numbers = #tpu.dot_dimension_numbers<[1], [0], [0], [1], [0, 0, 1, 1], [], []>} : vector<128x128xf32>, vector<128x128xf32>, vector<128x128xf32> -> vector<128x128xf32>
    %cst_4 = arith.constant 0.707106769 : f32
    %4 = vector.broadcast %cst_4 : f32 to vector<128x128xf32>
    %5 = arith.mulf %3, %4 : vector<128x128xf32>
    %c0_5 = arith.constant 0 : index
    %c0_6 = arith.constant 0 : index
    %c0_7 = arith.constant 0 : index
    %6 = vector.load %arg6[%c0_5, %c0_6, %c0_7] : memref<1x128x128xf32, #tpu.memory_space<vmem>>, vector<1x128x128xf32>
    %7 = vector.shape_cast %6 : vector<1x128x128xf32> to vector<128x128xf32>
    %8 = vector.shape_cast %5 : vector<128x128xf32> to vector<1x128x128xf32>
    tpu.vector_store %arg6[%c0_5, %c0_6, %c0_7], %8 {strides = array<i32>} : memref<1x128x128xf32, #tpu.memory_space<vmem>>, vector<1x128x128xf32>,
    %c0_8 = arith.constant 0 : index
    %c0_9 = arith.constant 0 : index
    %9 = vector.load %arg4[%c0_8, %c0_9] : memref<128x128xf32, #tpu.memory_space<vmem>>, vector<128x128xf32>
    %cst_10 = arith.constant dense<0.000000e+00> : vector<128x128xf32>
    %10 = tpu.matmul %1, %9, %cst_10 {dimension_numbers = #tpu.dot_dimension_numbers<[1], [0], [0], [1], [0, 0, 1, 1], [], []>} : vector<128x128xf32>, vector<128x128xf32>, vector<128x128xf32> -> vector<128x128xf32>
    %c0_11 = arith.constant 0 : index
    %c0_12 = arith.constant 0 : index
    %c0_13 = arith.constant 0 : index
    %11 = vector.load %arg7[%c0_11, %c0_12, %c0_13] : memref<1x128x128xf32, #tpu.memory_space<vmem>>, vector<1x128x128xf32>
    %12 = vector.shape_cast %11 : vector<1x128x128xf32> to vector<128x128xf32>
    %13 = vector.shape_cast %10 : vector<128x128xf32> to vector<1x128x128xf32>
    tpu.vector_store %arg7[%c0_11, %c0_12, %c0_13], %13 {strides = array<i32>} : memref<1x128x128xf32, #tpu.memory_space<vmem>>, vector<1x128x128xf32>,
    %c0_14 = arith.constant 0 : index
    %c0_15 = arith.constant 0 : index
    %14 = vector.load %arg5[%c0_14, %c0_15] : memref<128x128xf32, #tpu.memory_space<vmem>>, vector<128x128xf32>
    %cst_16 = arith.constant dense<0.000000e+00> : vector<128x128xf32>
    %15 = tpu.matmul %1, %14, %cst_16 {dimension_numbers = #tpu.dot_dimension_numbers<[1], [0], [0], [1], [0, 0, 1, 1], [], []>} : vector<128x128xf32>, vector<128x128xf32>, vector<128x128xf32> -> vector<128x128xf32>
    %c0_17 = arith.constant 0 : index
    %c0_18 = arith.constant 0 : index
    %c0_19 = arith.constant 0 : index
    %16 = vector.load %arg8[%c0_17, %c0_18, %c0_19] : memref<1x128x128xf32, #tpu.memory_space<vmem>>, vector<1x128x128xf32>
    %17 = vector.shape_cast %16 : vector<1x128x128xf32> to vector<128x128xf32>
    %18 = vector.shape_cast %15 : vector<128x128xf32> to vector<1x128x128xf32>
    tpu.vector_store %arg8[%c0_17, %c0_18, %c0_19], %18 {strides = array<i32>} : memref<1x128x128xf32, #tpu.memory_space<vmem>>, vector<1x128x128xf32>,
    return
  }
  func.func @transform_0(%arg0: i32, %arg1: i32) -> (i32, i32, i32) {
    %c0_i32 = arith.constant 0 : i32
    %c0_i32_0 = arith.constant 0 : i32
    return %arg0, %arg1, %c0_i32 : i32, i32, i32
  }
  func.func @transform_1(%arg0: i32, %arg1: i32) -> (i32, i32) {
    %c0_i32 = arith.constant 0 : i32
    %c0_i32_0 = arith.constant 0 : i32
    %c0_i32_1 = arith.constant 0 : i32
    return %c0_i32, %c0_i32_0 : i32, i32
  }
  func.func @transform_2(%arg0: i32, %arg1: i32) -> (i32, i32) {
    %c0_i32 = arith.constant 0 : i32
    %c0_i32_0 = arith.constant 0 : i32
    %c0_i32_1 = arith.constant 0 : i32
    return %c0_i32, %c0_i32_0 : i32, i32
  }
  func.func @transform_3(%arg0: i32, %arg1: i32) -> (i32, i32) {
    %c0_i32 = arith.constant 0 : i32
    %c0_i32_0 = arith.constant 0 : i32
    %c0_i32_1 = arith.constant 0 : i32
    return %c0_i32, %c0_i32_0 : i32, i32
  }
  func.func @transform_4(%arg0: i32, %arg1: i32) -> (i32, i32, i32) {
    %c0_i32 = arith.constant 0 : i32
    %c0_i32_0 = arith.constant 0 : i32
    return %arg0, %arg1, %c0_i32 : i32, i32, i32
  }
  func.func @transform_5(%arg0: i32, %arg1: i32) -> (i32, i32, i32) {
    %c0_i32 = arith.constant 0 : i32
    %c0_i32_0 = arith.constant 0 : i32
    return %arg0, %arg1, %c0_i32 : i32, i32, i32
  }
  func.func @transform_6(%arg0: i32, %arg1: i32) -> (i32, i32, i32) {
    %c0_i32 = arith.constant 0 : i32
    %c0_i32_0 = arith.constant 0 : i32
    return %arg0, %arg1, %c0_i32 : i32, i32, i32
  }
}

</mosaic_0001>

<bundles_post_ra>
// kernel: tpu_custom_call.1
= control target key start
LH: loop header
LB: loop body
LE: loop exit
PB: predicated region body
PF: predicated region fallthrough
CT: control target
= control target key end

     0   :  { %12 = vsyncpa [#allocation3], 0  ;;  %s2482_s0 = inlined_call_operand.hbm [shape: f32[2,128,128], index: 0, kind: input, shape index: {}]   ;;  %s2483_s1 = inlined_call_operand.hbm [shape: f32[128,128], index: 1, kind: input, shape index: {}]   ;;  %s2484_s2 = inlined_call_operand.hbm [shape: f32[128,128], index: 2, kind: input, shape index: {}]   ;;  %s2485_s3 = inlined_call_operand.hbm [shape: f32[128,128], index: 3, kind: input, shape index: {}]   ;;  %s2486_s4 = inlined_call_operand.hbm [shape: f32[2,128,128], index: 4, kind: output, shape index: {0}]   ;;  %s2487_s5 = inlined_call_operand.hbm [shape: f32[2,128,128], index: 5, kind: output, shape index: {1}]   ;;  %s2488_s6 = inlined_call_operand.hbm [shape: f32[2,128,128], index: 6, kind: output, shape index: {2}]  }
   0x1   :  { %14 = vsyncpa [#allocation3 + $0x1], 0 }
   0x2   :  { %15 = vsyncpa [#allocation6], 0 }
   0x3   :  { %16 = vsyncpa [#allocation9], 0 }
   0x4   :  { %17 = vsyncpa [#allocation4], 0 }
   0x5   :  { %19 = vsyncpa [#allocation4 + $0x1], 0 }
   0x6   :  { %20 = vsyncpa [#allocation12], 0 }
   0x7   :  { %22 = vsyncpa [#allocation12 + $0x1], 0  ;;  %s1994_s21 = smov 0   ;;  %s1996_s22 = smov 0  }
   0x8   :  { %s1998_s23 = smov 0   ;;  %s2000_s24 = smov 0  }
   0x9   :  { %s2002_s25 = smov 0   ;;  %s2004_s26 = smov 0  }
   0xa LB: > { %2495 = sst [smem:[#allocation19_spill]] %s1926_s21  ;;  %s2025_s27 = sadd.s32 4294967295, %s1946_s26   ;;  %s1946_s26 = sphi %s2004_s26, %s28_s26   ;;  %s1942_s25 = sphi %s2002_s25, %s2520_s25   ;;  %s1938_s24 = sphi %s2000_s24, %s2519_s24   ;;  %s1934_s23 = sphi %s1998_s23, %s2518_s23   ;;  %s1930_s22 = sphi %s1996_s22, %s2517_s22   ;;  %s1926_s21 = sphi %s1994_s21, %s2516_s21  }
   0xb   : > { %s2490_s28 = sadd.s32 4294967294, %s1946_s26   ;;  %p62_p0 = scmp.ne.s32.totalorder %s1930_s22, %s1926_s21 }
   0xc   : > { %p2489_p1 = scmp.eq.s32.totalorder %s2025_s27, 0  ;;  %p157_p3 = scmp.eq.s32.totalorder %s2490_s28, 1 }
   0xd   : > { %p1168_p5 = scmp.ge.s32.totalorder %s1946_s26, 1  ;;  %p220_p7 = scmp.lt.s32.totalorder %s1946_s26, 3 }
   0xe   : > { %p2036_p4 = por %p2489_p1, %p62_p0  ;;  %p2041_p6 = por %p157_p3, %p62_p0 }
   0xf   : > { %p2046_p8 = pnand %p1168_p5, %p220_p7  ;;  %s1948_s8 = smov [#allocation5]  }
  0x10   : > { %s2496_s29 = scalar_select %p2036_p4, 1, 0 }
  0x11   : > { %s2497_s30 = scalar_select %p2041_p6, 1, 0 }
  0x12   : > { %s2499_s7 = scalar_select %p2046_p8, 1, 0 }
  0x13   : > { %2498 = sst [smem:[#allocation20_spill]] %s2497_s30  ;;  %s232_s9 = sshll.u32 %s1948_s8, 4  ;;  %s2050_s9 = int_to_ptr.vmem [resolvable:$true] %s232_s9 }
  0x14   : > { %p1595_p9 = pneg %p2046_p8  ;;  %s1949_s11 = smov [#allocation7]  }
  0x15   : > { %s245_s12 = sshll.u32 %s1949_s11, 4  ;;  %s1950_s13 = smov [#allocation8]   ;;  %s2061_s12 = int_to_ptr.vmem [resolvable:$true] %s245_s12 }
  0x16   : > { %p2057_p11 = pnand %p1595_p9, %p2489_p1  ;;  %s2063_s14 = sshll.u32 %s1950_s13, 4  ;;  %s259_s14 = int_to_ptr.vmem [resolvable:$true] %s2063_s14 }
  0x17   : > { %s1682_s17 = scalar_lea.hbm %s2483_s1, 2048 }
  0x18   : > { %p1683_p12 = scmp.ne.s32.totalorder %s2483_s1, %s1682_s17  ;;  %p2073_p13 = pneg %p2057_p11 }
  0x19   : > { %p1689_p5 = scmp.lt.u32.totalorder %s1682_s17, %s2483_s1 }
  0x1a   : > { %p1685_p0 = pnand %p2073_p13, %p1683_p12 }
  0x1c   : > { %p1686_p3 = pneg %p1685_p0 }
  0x1e   : > { %p1691_p7 = pnand %p1689_p5, %p1686_p3 }
  0x20   : > { %1694 = shalt.err (!%p1691_p7)
}
  0x21   : > { %s1695_s13 = scalar_lea.vmem %s2050_s9, 2048  ;;  %p1703_p2 = scmp.lt.s32.totalorder %s2050_s9, %s2050_s9 }
  0x22   : > { %p1696_p9 = scmp.ne.s32.totalorder %s2050_s9, %s1695_s13  ;;  %p1704_p6 = scmp.lt.s32.totalorder %s1695_s13, %s1695_s13 }
  0x24   : > { %p1698_p10 = pnand %p1696_p9, %p2073_p13  ;;  %p1705_p12 = por %p1704_p6, %p1703_p2 }
  0x26   : > { %p1699_p1 = pneg %p1698_p10 }
  0x28   : > { %p1706_p0 = pnand %p1705_p12, %p1699_p1 }
  0x2a   : > { %1709 = shalt.err (!%p1706_p0)
}
  0x2b   : > { %s1951_s15 = smov 128   ;;  %s1952_s16 = smov 8  }
  0x2c   : > { %1598 = dma.hbm_to_vmem [thread:$0]  (!%p2057_p11), %s2483_s1, 2048, %s2050_s9, [#allocation6], %s1951_s15, %s1951_s15, %s1952_s16  }
  0x2d   : > { %s1710_s11 = scalar_lea.hbm %s2484_s2, 2048 }
  0x2e   : > { %p1711_p1 = scmp.ne.s32.totalorder %s2484_s2, %s1710_s11  ;;  %p1717_p10 = scmp.lt.u32.totalorder %s1710_s11, %s2484_s2 }
  0x30   : > { %p1713_p2 = pnand %p1711_p1, %p2073_p13 }
  0x32   : > { %p1714_p6 = pneg %p1713_p2 }
  0x34   : > { %p1719_p3 = pnand %p1717_p10, %p1714_p6 }
  0x36   : > { %1722 = shalt.err (!%p1719_p3)
}
  0x37   : > { %s1723_s9 = scalar_lea.vmem %s2061_s12, 2048  ;;  %p1731_p12 = scmp.lt.s32.totalorder %s2061_s12, %s2061_s12 }
  0x38   : > { %p1724_p5 = scmp.ne.s32.totalorder %s2061_s12, %s1723_s9  ;;  %p1732_p0 = scmp.lt.s32.totalorder %s1723_s9, %s1723_s9 }
  0x3a   : > { %p1726_p7 = pnand %p1724_p5, %p2073_p13  ;;  %p1733_p1 = por %p1732_p0, %p1731_p12 }
  0x3c   : > { %p1727_p9 = pneg %p1726_p7 }
  0x3e   : > { %p1734_p2 = pnand %p1733_p1, %p1727_p9 }
  0x40   : > { %1737 = shalt.err (!%p1734_p2)
}
  0x41   : > { %1601 = dma.hbm_to_vmem [thread:$0]  (!%p2057_p11), %s2484_s2, 2048, %s2061_s12, [#allocation6], %s1951_s15, %s1951_s15, %s1952_s16  }
  0x42   : > { %s1738_s18 = scalar_lea.hbm %s2485_s3, 2048 }
  0x43   : > { %p1739_p6 = scmp.ne.s32.totalorder %s2485_s3, %s1738_s18  ;;  %p1745_p5 = scmp.lt.u32.totalorder %s1738_s18, %s2485_s3 }
  0x45   : > { %p1741_p10 = pnand %p1739_p6, %p2073_p13 }
  0x47   : > { %p1742_p3 = pneg %p1741_p10 }
  0x49   : > { %p1747_p7 = pnand %p1745_p5, %p1742_p3 }
  0x4b   : > { %1750 = shalt.err (!%p1747_p7)
}
  0x4c   : > { %s1751_s9 = scalar_lea.vmem %s259_s14, 2048  ;;  %p1759_p1 = scmp.lt.s32.totalorder %s259_s14, %s259_s14 }
  0x4d   : > { %p1752_p9 = scmp.ne.s32.totalorder %s259_s14, %s1751_s9  ;;  %p1760_p2 = scmp.lt.s32.totalorder %s1751_s9, %s1751_s9 }
  0x4f   : > { %p1754_p12 = pnand %p1752_p9, %p2073_p13  ;;  %p1761_p4 = por %p1760_p2, %p1759_p1 }
  0x51   : > { %p1755_p0 = pneg %p1754_p12 }
  0x53   : > { %p1762_p8 = pnand %p1761_p4, %p1755_p0 }
  0x55   : > { %1765 = shalt.err (!%p1762_p8)
}
  0x56   : > { %1604 = dma.hbm_to_vmem [thread:$0]  (!%p2057_p11), %s2485_s3, 2048, %s259_s14, [#allocation9], %s1951_s15, %s1951_s15, %s1952_s16  }
  0x57   : > { %s49_s20 = sadd.s32 1, %s1934_s23  ;;  %s40_s10 = sadd.s32 1, %s1942_s25 }
  0x58   : > { %p56_p4 = scmp.ne.s32.totalorder %s1934_s23, %s1930_s22  ;;  %p42_p8 = scmp.ge.s32.totalorder %s40_s10, 2 }
  0x59   : > { %p57_p13 = scmp.eq.s32.totalorder %s1946_s26, 0  ;;  %p2502_p6 = scmp.eq.s32.totalorder %s2025_s27, 1 }
  0x5a   : > { %p1622_p3 = scmp.lt.s32.totalorder %s1946_s26, 2  ;;  %s2522_s10 = smov (%p42_p8, %s40_s10), 0 }
  0x5b   : > { %p2152_p10 = por %p2502_p6, %p56_p4  ;;  %p58_p5 = por %p57_p13, %p56_p4 }
  0x5c   : > { %s272_s30 = sand.u32 1, %s1934_s23   ;;  %s44_s17 = ssub.s32 %s1942_s25, %s2522_s10 }
  0x5d   : > { %p47_p7 = scmp.eq.s32.totalorder %s44_s17, 0  ;;  %s1173_s14 = sshll.u32 %s272_s30, 7 }
  0x5e   : > { %s1195_s18 = sshll.u32 %s1942_s25, 11  ;;  %s276_s9 = scalar_lea.vmem [#allocation2], %s1173_s14 }
  0x5f   : > { %s2164_s19 = scalar_select %p47_p7, %s1934_s23, %s49_s20  }
  0x60   : > { %s2169_s13 = scalar_lea.hbm %s2482_s0, %s1195_s18  ;;  %s285_s12 = sshll.u32 %s276_s9, 4  ;;  %s2171_s12 = int_to_ptr.vmem [resolvable:$true] %s285_s12 }
  0x61   : > { %p2175_p11 = pnand %p1622_p3, %p58_p5  ;;  %s2179_s20 = scalar_lea.sflag [#allocation3], %s272_s30 }
  0x62   : > { %s1766_s17 = scalar_lea.hbm %s2169_s13, 2048  ;;  %s1771_s8 = scalar_lea.hbm %s2482_s0, 4096 }
  0x63   : > { %p1767_p9 = scmp.ne.s32.totalorder %s2169_s13, %s1766_s17  ;;  %p1768_p12 = pneg %p2175_p11 }
  0x64   : > { %p1772_p2 = scmp.lt.u32.totalorder %s2169_s13, %s2482_s0  ;;  %p1773_p4 = scmp.lt.u32.totalorder %s1771_s8, %s1766_s17 }
  0x65   : > { %p1769_p0 = pnand %p1768_p12, %p1767_p9  ;;  %p1775_p13 = scmp.lt.u32.totalorder %s1766_s17, %s2169_s13 }
  0x66   : > { %p1774_p8 = por %p1773_p4, %p1772_p2 }
  0x67   : > { %p1770_p1 = pneg %p1769_p0 }
  0x68   : > { %p1776_p6 = por %p1775_p13, %p1774_p8 }
  0x6a   : > { %p1777_p3 = pnand %p1776_p6, %p1770_p1 }
  0x6c   : > { %1780 = shalt.err (!%p1777_p3)
}
  0x6d   : > { %s1781_s30 = scalar_lea.vmem %s2171_s12, 2048  ;;  %s1953_s14 = smov [#allocation2]  }
  0x6e   : > { %p1782_p5 = scmp.ne.s32.totalorder %s2171_s12, %s1781_s30  ;;  %s1786_s18 = sshll.u32 %s1953_s14, 4  ;;  %s1787_s18 = int_to_ptr.vmem [resolvable:$false] %s1786_s18 }
  0x6f   : > { %s1788_s11 = scalar_lea.vmem %s1787_s18, 4096  ;;  %p1789_p0 = scmp.lt.s32.totalorder %s2171_s12, %s1787_s18 }
  0x70   : > { %p1784_p7 = pnand %p1782_p5, %p1768_p12  ;;  %p1790_p2 = scmp.lt.s32.totalorder %s1788_s11, %s1781_s30 }
  0x72   : > { %p1785_p9 = pneg %p1784_p7  ;;  %p1791_p4 = por %p1790_p2, %p1789_p0 }
  0x74   : > { %p1792_p8 = pnand %p1791_p4, %p1785_p9 }
  0x76   : > { %1795 = shalt.err (!%p1792_p8)
}
  0x77   : > { %1608 = dma.hbm_to_vmem [thread:$0]  (!%p2175_p11), %s2169_s13, 2048, %s2171_s12, %s2179_s20, %s1951_s15, %s1951_s15, %s1952_s16  }
  0x78   : > { %p2505_p12 = scmp.ne.s32.totalorder %s2499_s7, 0 }
  0x79   : > { %s2213_s17 = sand.u32 (!%p2505_p12), 1, %s1930_s22   ;;  %p2506_p1 = scmp.ne.s32.totalorder (!%p2505_p12), %s2496_s29, 0 }
  0x7a   : > { %297 = sbr.rel (%p2505_p12) target bundleno = 475 (0x1db), region = 36  ;;  %s2216_s8 = sshll.u32 (!%p2505_p12), %s2213_s17, 7 }
  0x7b   : > { %s300_s21 = scalar_lea.sflag (!%p2505_p12), [#allocation3], %s2213_s17  ;;  %s2220_s9 = scalar_lea.vmem (!%p2505_p12), [#allocation2], %s2216_s8 }
  0x81   : > { %1905 = dma.done.wait (%p2506_p1), %s300_s21, 2048  }
  0x82   : > { %1907 = vsyncadd (%p2506_p1), %s300_s21, 4294965248  ;;  %p2507_p11 = scmp.eq.s32.totalorder %s2025_s27, 0 }
  0x84   : > { %1909 = dma.done.wait (%p2507_p11), [#allocation6], 4096   ;;  %p2508_p13 = pmov %p2507_p11 }
  0x85   : > { %p2509_p6 = pmov %p2507_p11 }
  0x86   : > { %1911 = vsyncadd (%p2508_p13), [#allocation6], 4294963200 }
  0x87   : > { %1913 = dma.done.wait (%p2509_p6), [#allocation9], 2048   ;;  %p2510_p3 = pmov %p2509_p6 }
  0x88   : > { %v374_v0 = vld [vmem:[#allocation5] sm:$0xff]  ;;  %v375_v1 = vld [vmem:[#allocation5 + $0x8] sm:$0xff]  ;;  %v376_v5 = vld [vmem:[#allocation5 + $0x10] sm:$0xff]  ;;  %s2291_s29 = scalar_lea.vmem [#allocation11], %s2216_s8  ;;  %s2295_s7 = scalar_lea.vmem [#allocation10], %s2216_s8 }
  0x89   : > { %1915 = vsyncadd (%p2510_p3), [#allocation9], 4294965248  ;;  %v567_v2 = vld [vmem:[#allocation7] sm:$0xff]  ;;  %v1463_v3 = vpack.c.bf16 %v375_v1, %v374_v0  ;;  %v568_v4 = vld [vmem:[#allocation7 + $0x8] sm:$0xff]  ;;  %s926_s15 = sand.u32 1, %s2025_s27   ;;  %s2322_s16 = sshll.u32 %s1938_s24, 11 }
  0x8a   : > { %v377_v6 = vld [vmem:[#allocation5 + $0x18] sm:$0xff]  ;;  %v1495_v7 = vpack.c.bf16 %v568_v4, %v567_v2  ;;  %v569_v9 = vld [vmem:[#allocation7 + $0x10] sm:$0xff]  ;;  %v378_v11 = vld [vmem:[#allocation5 + $0x20] sm:$0xff]  ;;  %s965_s13 = sshll.u32 %s2291_s29, 4  ;;  %s947_s27 = sshll.u32 %s2295_s7, 4  ;;  %s2336_s13 = int_to_ptr.vmem [resolvable:$true] %s965_s13  ;;  %s2345_s27 = int_to_ptr.vmem [resolvable:$true] %s947_s27 }
  0x8b   : > { %v1467_v8 = vpack.c.bf16 %v377_v6, %v376_v5  ;;  %v570_v10 = vld [vmem:[#allocation7 + $0x18] sm:$0xff]  ;;  %1464 = vmatprep.subr.bf16.mxu0 %v1463_v3  ;;  %v379_v13 = vld [vmem:[#allocation5 + $0x28] sm:$0xff]  ;;  %v571_v14 = vld [vmem:[#allocation7 + $0x20] sm:$0xff]  ;;  %s2334_s30 = scalar_lea.hbm %s2487_s5, %s2322_s16  ;;  %s2343_s18 = scalar_lea.hbm %s2486_s4, %s2322_s16 }
  0x8c   : > { %v1499_v12 = vpack.c.bf16 %v570_v10, %v569_v9  ;;  %v572_v15 = vld [vmem:[#allocation7 + $0x28] sm:$0xff]  ;;  %1496 = vmatprep.subr.bf16.mxu1 %v1495_v7  ;;  %1466 = vmatpush3.bf16.msra.mxu0 %v1463_v3  ;;  %v1471_v16 = vpack.c.bf16 %v379_v13, %v378_v11  ;;  %v380_v18 = vld [vmem:[#allocation5 + $0x30] sm:$0xff]  ;;  %v381_v19 = vld [vmem:[#allocation5 + $0x38] sm:$0xff]  ;;  %s2350_s11 = scalar_lea.sflag [#allocation12], %s926_s15  ;;  %s1796_s21 = scalar_lea.vmem %s2336_s13, 2048 }
  0x8d   : > { %1498 = vmatpush3.bf16.msra.mxu1 %v1495_v7  ;;  %1468 = vmatprep.subr.bf16.mxu0 %v1467_v8  ;;  %v1503_v17 = vpack.c.bf16 %v572_v15, %v571_v14  ;;  %v573_v20 = vld [vmem:[#allocation7 + $0x30] sm:$0xff]  ;;  %v574_v21 = vld [vmem:[#allocation7 + $0x38] sm:$0xff]  ;;  %v1475_v22 = vpack.c.bf16 %v381_v19, %v380_v18  ;;  %v382_v24 = vld [vmem:[#allocation5 + $0x40] sm:$0xff]  ;;  %p1797_p5 = scmp.ne.s32.totalorder %s2336_s13, %s1796_s21 }
  0x8e   : > { %1500 = vmatprep.subr.bf16.mxu1 %v1499_v12  ;;  %v1507_v23 = vpack.c.bf16 %v574_v21, %v573_v20  ;;  %v383_v25 = vld [vmem:[#allocation5 + $0x48] sm:$0xff]  ;;  %v2235_v26 = vld [vmem:[%s2220_s9] sm:$0xff]  ;;  %v384_v31 = vld [vmem:[#allocation5 + $0x50] sm:$0xff] }
  0x8f   : > { %v575_v27 = vld [vmem:[#allocation7 + $0x40] sm:$0xff]  ;;  %v576_v28 = vld [vmem:[#allocation7 + $0x48] sm:$0xff]  ;;  %1327 = vmatprep.mubr.f32.mxu0 %v2235_v26  ;;  %1383 = vmatprep.mubr.f32.mxu1 %v2235_v26  ;;  %v1479_v29 = vpack.c.bf16 %v383_v25, %v382_v24  ;;  %v385_v32 = vld [vmem:[#allocation5 + $0x58] sm:$0xff]  ;;  %p1798_p7 = pnand %p1797_p5, %p2152_p10 }
  0x90   : > { %1470 = vmatpush3.bf16.msra.mxu0 %v1467_v8  ;;  %v1511_v30 = vpack.c.bf16 %v576_v28, %v575_v27  ;;  %v577_v33 = vld [vmem:[#allocation7 + $0x50] sm:$0xff]  ;;  %v578_v34 = vld [vmem:[#allocation7 + $0x58] sm:$0xff]  ;;  %v1483_v35 = vpack.c.bf16 %v385_v32, %v384_v31  ;;  %v386_v37 = vld [vmem:[#allocation5 + $0x60] sm:$0xff] }
  0x91   : > { %1502 = vmatpush3.bf16.msra.mxu1 %v1499_v12  ;;  %1472 = vmatprep.subr.bf16.mxu0 %v1471_v16  ;;  %v1515_v36 = vpack.c.bf16 %v578_v34, %v577_v33  ;;  %v387_v38 = vld [vmem:[#allocation5 + $0x68] sm:$0xff]  ;;  %v579_v39 = vld [vmem:[#allocation7 + $0x60] sm:$0xff]  ;;  %v388_v43 = vld [vmem:[#allocation5 + $0x70] sm:$0xff]  ;;  %p1799_p9 = pneg %p1798_p7 }
  0x92   : > { %1504 = vmatprep.subr.bf16.mxu1 %v1503_v17  ;;  %v580_v40 = vld [vmem:[#allocation7 + $0x68] sm:$0xff]  ;;  %v1487_v41 = vpack.c.bf16 %v387_v38, %v386_v37  ;;  %v389_v44 = vld [vmem:[#allocation5 + $0x78] sm:$0xff]  ;;  %v581_v45 = vld [vmem:[#allocation7 + $0x70] sm:$0xff] }
  0x93   : > { %v1519_v42 = vpack.c.bf16 %v580_v40, %v579_v39  ;;  %v582_v46 = vld [vmem:[#allocation7 + $0x78] sm:$0xff]  ;;  %v1491_v47 = vpack.c.bf16 %v389_v44, %v388_v43  ;;  %v744_v49 = vld [vmem:[#allocation8] sm:$0xff]  ;;  %v745_v50 = vld [vmem:[#allocation8 + $0x8] sm:$0xff] }
  0x94   : > { %1474 = vmatpush3.bf16.msra.mxu0 %v1471_v16  ;;  %v1523_v48 = vpack.c.bf16 %v582_v46, %v581_v45  ;;  %v1527_v51 = vpack.c.bf16 %v745_v50, %v744_v49  ;;  %v746_v52 = vld [vmem:[#allocation8 + $0x10] sm:$0xff]  ;;  %v747_v53 = vld [vmem:[#allocation8 + $0x18] sm:$0xff]  ;;  %v2240_v54 = vld [vmem:[%s2220_s9 + $0x8] sm:$0xff] }
  0x95   : > { %1506 = vmatpush3.bf16.msra.mxu1 %v1503_v17  ;;  %1476 = vmatprep.subr.bf16.mxu0 %v1475_v22  ;;  %v2243_v55 = vld [vmem:[%s2220_s9 + $0x10] sm:$0xff]  ;;  %v1531_v56 = vpack.c.bf16 %v747_v53, %v746_v52  ;;  %v748_v57 = vld [vmem:[#allocation8 + $0x20] sm:$0xff]  ;;  %v749_v58 = vld [vmem:[#allocation8 + $0x28] sm:$0xff] }
  0x96   : > { %1508 = vmatprep.subr.bf16.mxu1 %v1507_v23  ;;  %v2248_v59 = vld [vmem:[%s2220_s9 + $0x18] sm:$0xff]  ;;  %v2253_v60 = vld [vmem:[%s2220_s9 + $0x20] sm:$0xff]  ;;  %v1535_v61 = vpack.c.bf16 %v749_v58, %v748_v57  ;;  %v750_v62 = vld [vmem:[#allocation8 + $0x30] sm:$0xff] }
  0x97   : > { %v751_v63 = vld [vmem:[#allocation8 + $0x38] sm:$0xff]  ;;  %v2258_v0 = vld [vmem:[%s2220_s9 + $0x28] sm:$0xff]  ;;  %v2263_v1 = vld [vmem:[%s2220_s9 + $0x30] sm:$0xff] }
  0x98   : > { %1478 = vmatpush3.bf16.msra.mxu0 %v1475_v22  ;;  %v1539_v2 = vpack.c.bf16 %v751_v63, %v750_v62  ;;  %v752_v3 = vld [vmem:[#allocation8 + $0x40] sm:$0xff]  ;;  %v753_v4 = vld [vmem:[#allocation8 + $0x48] sm:$0xff]  ;;  %v2268_v5 = vld [vmem:[%s2220_s9 + $0x38] sm:$0xff] }
  0x99   : > { %1510 = vmatpush3.bf16.msra.mxu1 %v1507_v23  ;;  %1480 = vmatprep.subr.bf16.mxu0 %v1479_v29  ;;  %v366_v6 = vld [vmem:[%s2220_s9 + $0x40] sm:$0xff]  ;;  %v1543_v7 = vpack.c.bf16 %v753_v4, %v752_v3  ;;  %v754_v8 = vld [vmem:[#allocation8 + $0x50] sm:$0xff]  ;;  %v755_v9 = vld [vmem:[#allocation8 + $0x58] sm:$0xff] }
  0x9a   : > { %1512 = vmatprep.subr.bf16.mxu1 %v1511_v30  ;;  %v367_v10 = vld [vmem:[%s2220_s9 + $0x48] sm:$0xff]  ;;  %v368_v11 = vld [vmem:[%s2220_s9 + $0x50] sm:$0xff]  ;;  %v1547_v12 = vpack.c.bf16 %v755_v9, %v754_v8  ;;  %v756_v13 = vld [vmem:[#allocation8 + $0x60] sm:$0xff] }
  0x9b   : > { %v757_v14 = vld [vmem:[#allocation8 + $0x68] sm:$0xff]  ;;  %v369_v15 = vld [vmem:[%s2220_s9 + $0x58] sm:$0xff]  ;;  %v370_v16 = vld [vmem:[%s2220_s9 + $0x60] sm:$0xff] }
  0x9c   : > { %1482 = vmatpush3.bf16.msra.mxu0 %v1479_v29  ;;  %v1551_v17 = vpack.c.bf16 %v757_v14, %v756_v13  ;;  %v758_v18 = vld [vmem:[#allocation8 + $0x70] sm:$0xff]  ;;  %v759_v19 = vld [vmem:[#allocation8 + $0x78] sm:$0xff]  ;;  %v371_v20 = vld [vmem:[%s2220_s9 + $0x68] sm:$0xff] }
  0x9d   : > { %1514 = vmatpush3.bf16.msra.mxu1 %v1511_v30  ;;  %1484 = vmatprep.subr.bf16.mxu0 %v1483_v35  ;;  %v372_v21 = vld [vmem:[%s2220_s9 + $0x70] sm:$0xff]  ;;  %v1555_v22 = vpack.c.bf16 %v759_v19, %v758_v18  ;;  %v373_v23 = vld [vmem:[%s2220_s9 + $0x78] sm:$0xff]  ;;  %s1954_s9 = smov [#allocation11]  }
  0x9e   : > { %1516 = vmatprep.subr.bf16.mxu1 %v1515_v36  ;;  %s1800_s12 = sshll.u32 %s1954_s9, 4  ;;  %s1801_s12 = int_to_ptr.vmem [resolvable:$false] %s1800_s12 }
  0x9f   : > { %s1802_s20 = scalar_lea.vmem %s1801_s12, 4096  ;;  %p1803_p0 = scmp.lt.s32.totalorder %s2336_s13, %s1801_s12 }
  0xa0   : > { %1486 = vmatpush3.bf16.msra.mxu0 %v1483_v35  ;;  %p1804_p2 = scmp.lt.s32.totalorder %s1802_s20, %s1796_s21 }
  0xa1   : > { %1518 = vmatpush3.bf16.msra.mxu1 %v1515_v36  ;;  %1488 = vmatprep.subr.bf16.mxu0 %v1487_v41 }
  0xa2   : > { %1520 = vmatprep.subr.bf16.mxu1 %v1519_v42  ;;  %p1805_p4 = por %p1804_p2, %p1803_p0 }
  0xa4   : > { %1490 = vmatpush3.bf16.msra.mxu0 %v1487_v41  ;;  %p1806_p8 = pnand %p1805_p4, %p1799_p9 }
  0xa5   : > { %1522 = vmatpush3.bf16.msra.mxu1 %v1519_v42  ;;  %1492 = vmatprep.subr.bf16.mxu0 %v1491_v47 }
  0xa6   : > { %1524 = vmatprep.subr.bf16.mxu1 %v1523_v48 }
  0xa8   : > { %1494 = vmatpush3.bf16.msra.mxu0 %v1491_v47 }
  0xa9   : > { %1526 = vmatpush3.bf16.msra.mxu1 %v1523_v48  ;;  %1528 = vmatprep.subr.bf16.mxu0 %v1527_v51 }
  0xaa   : > { %1559 = vmatprep.subr.bf16.mxu1 %v1527_v51 }
  0xab   : > { %1328 = vmatmul.mubr.f32.vlgmr.msra.gmra.mrb[0].mxu0 %v2240_v54 }
  0xac   : > { %1384 = vmatmul.mubr.f32.vlgmr.msra.gmra.mrb[0].mxu1 %v2240_v54  ;;  %1530 = vmatpush3.bf16.msra.mxu0 %v1527_v51 }
  0xad   : > { %1567 = vmatpush3.bf16.msra.mxu1 %v1527_v51  ;;  %1330 = vmatprep.mubr.f32.mxu0 %v2243_v55 }
  0xae   : > { %1386 = vmatprep.mubr.f32.mxu1 %v2243_v55  ;;  %1532 = vmatprep.subr.bf16.mxu0 %v1531_v56 }
  0xaf   : > { %1331 = vmatmul.mubr.f32.gmra.mrb[2].mxu0 %v2248_v59  ;;  %1560 = vmatprep.subr.bf16.mxu1 %v1531_v56 }
  0xb0   : > { %1387 = vmatmul.mubr.f32.gmra.mrb[2].mxu1 %v2248_v59  ;;  %1534 = vmatpush3.bf16.msra.mxu0 %v1531_v56 }
  0xb1   : > { %1568 = vmatpush3.bf16.msra.mxu1 %v1531_v56  ;;  %1333 = vmatprep.mubr.f32.mxu0 %v2253_v60 }
  0xb2   : > { %1389 = vmatprep.mubr.f32.mxu1 %v2253_v60  ;;  %1536 = vmatprep.subr.bf16.mxu0 %v1535_v61 }
  0xb3   : > { %1334 = vmatmul.mubr.f32.gmra.mrb[4].mxu0 %v2258_v0  ;;  %1561 = vmatprep.subr.bf16.mxu1 %v1535_v61 }
  0xb4   : > { %1390 = vmatmul.mubr.f32.gmra.mrb[4].mxu1 %v2258_v0  ;;  %1538 = vmatpush3.bf16.msra.mxu0 %v1535_v61 }
  0xb5   : > { %1569 = vmatpush3.bf16.msra.mxu1 %v1535_v61  ;;  %1336 = vmatprep.mubr.f32.mxu0 %v2263_v1 }
  0xb6   : > { %1392 = vmatprep.mubr.f32.mxu1 %v2263_v1  ;;  %1540 = vmatprep.subr.bf16.mxu0 %v1539_v2 }
  0xb7   : > { %1337 = vmatmul.mubr.f32.gmra.mrb[6].mxu0 %v2268_v5  ;;  %1562 = vmatprep.subr.bf16.mxu1 %v1539_v2 }
  0xb8   : > { %1393 = vmatmul.mubr.f32.gmra.mrb[6].mxu1 %v2268_v5  ;;  %1542 = vmatpush3.bf16.msra.mxu0 %v1539_v2 }
  0xb9   : > { %1570 = vmatpush3.bf16.msra.mxu1 %v1539_v2  ;;  %1339 = vmatprep.mubr.f32.mxu0 %v366_v6 }
  0xba   : > { %1395 = vmatprep.mubr.f32.mxu1 %v366_v6  ;;  %1544 = vmatprep.subr.bf16.mxu0 %v1543_v7 }
  0xbb   : > { %1340 = vmatmul.mubr.f32.gmra.mrb[8].mxu0 %v367_v10  ;;  %1563 = vmatprep.subr.bf16.mxu1 %v1543_v7 }
  0xbc   : > { %1396 = vmatmul.mubr.f32.gmra.mrb[8].mxu1 %v367_v10  ;;  %1546 = vmatpush3.bf16.msra.mxu0 %v1543_v7 }
  0xbd   : > { %1571 = vmatpush3.bf16.msra.mxu1 %v1543_v7  ;;  %1342 = vmatprep.mubr.f32.mxu0 %v368_v11 }
  0xbe   : > { %1398 = vmatprep.mubr.f32.mxu1 %v368_v11  ;;  %1548 = vmatprep.subr.bf16.mxu0 %v1547_v12 }
  0xbf   : > { %1343 = vmatmul.mubr.f32.gmra.mrb[10].mxu0 %v369_v15  ;;  %1564 = vmatprep.subr.bf16.mxu1 %v1547_v12 }
  0xc0   : > { %1399 = vmatmul.mubr.f32.gmra.mrb[10].mxu1 %v369_v15  ;;  %1550 = vmatpush3.bf16.msra.mxu0 %v1547_v12 }
  0xc1   : > { %1572 = vmatpush3.bf16.msra.mxu1 %v1547_v12  ;;  %1345 = vmatprep.mubr.f32.mxu0 %v370_v16 }
  0xc2   : > { %1401 = vmatprep.mubr.f32.mxu1 %v370_v16  ;;  %1552 = vmatprep.subr.bf16.mxu0 %v1551_v17 }
  0xc3   : > { %1346 = vmatmul.mubr.f32.gmra.mrb[12].mxu0 %v371_v20  ;;  %1565 = vmatprep.subr.bf16.mxu1 %v1551_v17 }
  0xc4   : > { %1402 = vmatmul.mubr.f32.gmra.mrb[12].mxu1 %v371_v20  ;;  %1554 = vmatpush3.bf16.msra.mxu0 %v1551_v17 }
  0xc5   : > { %1573 = vmatpush3.bf16.msra.mxu1 %v1551_v17  ;;  %1348 = vmatprep.mubr.f32.mxu0 %v372_v21 }
  0xc6   : > { %1404 = vmatprep.mubr.f32.mxu1 %v372_v21  ;;  %1556 = vmatprep.subr.bf16.mxu0 %v1555_v22 }
  0xc7   : > { %1349 = vmatmul.mubr.f32.gmra.mrb[14].mxu0 %v373_v23  ;;  %1566 = vmatprep.subr.bf16.mxu1 %v1555_v22 }
  0xc8   : > { %1405 = vmatmul.mubr.f32.gmra.mrb[14].mxu1 %v373_v23  ;;  %1558 = vmatpush3.bf16.msra.mxu0 %v1555_v22 }
  0xc9   : > { %1574 = vmatpush3.bf16.msra.mxu1 %v1555_v22  ;;  %1439 = vmatprep.mubr.f32.mxu0 %v2235_v26 }
  0xca   : > { %1451 = vmatprep.mubr.f32.mxu1 %v366_v6 }
  0xcb   : > { %1440 = vmatmul.mubr.f32.vlgmr.msra.gmra.mrb[16].mxu0 %v2240_v54 }
  0xcc   : > { %1452 = vmatmul.mubr.f32.vlgmr.msra.gmra.mrb[16].mxu1 %v367_v10  ;;  %1442 = vmatprep.mubr.f32.mxu0 %v2243_v55 }
  0xcd   : > { %1454 = vmatprep.mubr.f32.mxu1 %v368_v11 }
  0xcf   : > { %1443 = vmatmul.mubr.f32.gmra.mrb[18].mxu0 %v2248_v59 }
  0xd0   : > { %1455 = vmatmul.mubr.f32.gmra.mrb[18].mxu1 %v369_v15  ;;  %1445 = vmatprep.mubr.f32.mxu0 %v2253_v60 }
  0xd1   : > { %1457 = vmatprep.mubr.f32.mxu1 %v370_v16 }
  0xd3   : > { %1446 = vmatmul.mubr.f32.gmra.mrb[20].mxu0 %v2258_v0 }
  0xd4   : > { %1458 = vmatmul.mubr.f32.gmra.mrb[20].mxu1 %v371_v20  ;;  %1448 = vmatprep.mubr.f32.mxu0 %v2263_v1 }
  0xd5   : > { %1460 = vmatprep.mubr.f32.mxu1 %v372_v21 }
  0xd7   : > { %1449 = vmatmul.mubr.f32.gmra.mrb[22].mxu0 %v2268_v5 }
  0xd8   : > { %1461 = vmatmul.mubr.f32.gmra.mrb[22].mxu1 %v373_v23 }
 0x17e   : > { %v1329_v24 = vpop.f32.mrb[0].mxu0 }
 0x17f   : > { %v536_v25 = vmul.f32 0.70710677, %v1329_v24  ;;  %v1385_v26 = vpop.f32.mrb[0].mxu1  ;;  %v456_v27 = vpop.f32.mrb[1].mxu0 }
 0x180   : > { %729 = vst [vmem:[%s2291_s29 + $0x8] sm:$0xff] %v1385_v26  ;;  %v535_v28 = vmul.f32 0.70710677, %v456_v27  ;;  %v649_v29 = vpop.f32.mrb[1].mxu1 }
 0x181   : > { %552 = vst [vmem:[%s2295_s7 + $0x8] sm:$0xff] %v536_v25  ;;  %728 = vst [vmem:[%s2291_s29] sm:$0xff] %v649_v29 }
 0x182   : > { %551 = vst [vmem:[%s2295_s7] sm:$0xff] %v535_v28  ;;  %v1332_v30 = vpop.f32.mrb[2].mxu0 }
 0x183   : > { %v538_v31 = vmul.f32 0.70710677, %v1332_v30  ;;  %v1388_v32 = vpop.f32.mrb[2].mxu1  ;;  %v466_v33 = vpop.f32.mrb[3].mxu0 }
 0x184   : > { %731 = vst [vmem:[%s2291_s29 + $0x18] sm:$0xff] %v1388_v32  ;;  %v537_v34 = vmul.f32 0.70710677, %v466_v33  ;;  %v659_v35 = vpop.f32.mrb[3].mxu1 }
 0x185   : > { %554 = vst [vmem:[%s2295_s7 + $0x18] sm:$0xff] %v538_v31  ;;  %730 = vst [vmem:[%s2291_s29 + $0x10] sm:$0xff] %v659_v35 }
 0x186   : > { %553 = vst [vmem:[%s2295_s7 + $0x10] sm:$0xff] %v537_v34  ;;  %v1335_v36 = vpop.f32.mrb[4].mxu0 }
 0x187   : > { %v540_v37 = vmul.f32 0.70710677, %v1335_v36  ;;  %v1391_v38 = vpop.f32.mrb[4].mxu1  ;;  %v476_v39 = vpop.f32.mrb[5].mxu0 }
 0x188   : > { %733 = vst [vmem:[%s2291_s29 + $0x28] sm:$0xff] %v1391_v38  ;;  %v539_v40 = vmul.f32 0.70710677, %v476_v39  ;;  %v669_v41 = vpop.f32.mrb[5].mxu1 }
 0x189   : > { %556 = vst [vmem:[%s2295_s7 + $0x28] sm:$0xff] %v540_v37  ;;  %732 = vst [vmem:[%s2291_s29 + $0x20] sm:$0xff] %v669_v41 }
 0x18a   : > { %555 = vst [vmem:[%s2295_s7 + $0x20] sm:$0xff] %v539_v40  ;;  %v1338_v42 = vpop.f32.mrb[6].mxu0 }
 0x18b   : > { %v542_v43 = vmul.f32 0.70710677, %v1338_v42  ;;  %v1394_v44 = vpop.f32.mrb[6].mxu1  ;;  %v486_v45 = vpop.f32.mrb[7].mxu0 }
 0x18c   : > { %735 = vst [vmem:[%s2291_s29 + $0x38] sm:$0xff] %v1394_v44  ;;  %v541_v46 = vmul.f32 0.70710677, %v486_v45  ;;  %v679_v47 = vpop.f32.mrb[7].mxu1 }
 0x18d   : > { %558 = vst [vmem:[%s2295_s7 + $0x38] sm:$0xff] %v542_v43  ;;  %734 = vst [vmem:[%s2291_s29 + $0x30] sm:$0xff] %v679_v47 }
 0x18e   : > { %557 = vst [vmem:[%s2295_s7 + $0x30] sm:$0xff] %v541_v46  ;;  %v1341_v48 = vpop.f32.mrb[8].mxu0 }
 0x18f   : > { %v544_v49 = vmul.f32 0.70710677, %v1341_v48  ;;  %v1397_v50 = vpop.f32.mrb[8].mxu1  ;;  %v496_v51 = vpop.f32.mrb[9].mxu0 }
 0x190   : > { %737 = vst [vmem:[%s2291_s29 + $0x48] sm:$0xff] %v1397_v50  ;;  %v543_v52 = vmul.f32 0.70710677, %v496_v51  ;;  %v689_v53 = vpop.f32.mrb[9].mxu1 }
 0x191   : > { %560 = vst [vmem:[%s2295_s7 + $0x48] sm:$0xff] %v544_v49  ;;  %736 = vst [vmem:[%s2291_s29 + $0x40] sm:$0xff] %v689_v53 }
 0x192   : > { %559 = vst [vmem:[%s2295_s7 + $0x40] sm:$0xff] %v543_v52  ;;  %v1344_v54 = vpop.f32.mrb[10].mxu0 }
 0x193   : > { %v546_v55 = vmul.f32 0.70710677, %v1344_v54  ;;  %v1400_v56 = vpop.f32.mrb[10].mxu1  ;;  %v506_v57 = vpop.f32.mrb[11].mxu0 }
 0x194   : > { %739 = vst [vmem:[%s2291_s29 + $0x58] sm:$0xff] %v1400_v56  ;;  %v545_v58 = vmul.f32 0.70710677, %v506_v57  ;;  %v699_v59 = vpop.f32.mrb[11].mxu1 }
 0x195   : > { %562 = vst [vmem:[%s2295_s7 + $0x58] sm:$0xff] %v546_v55  ;;  %738 = vst [vmem:[%s2291_s29 + $0x50] sm:$0xff] %v699_v59 }
 0x196   : > { %561 = vst [vmem:[%s2295_s7 + $0x50] sm:$0xff] %v545_v58  ;;  %v1347_v60 = vpop.f32.mrb[12].mxu0 }
 0x197   : > { %v548_v61 = vmul.f32 0.70710677, %v1347_v60  ;;  %v1403_v62 = vpop.f32.mrb[12].mxu1  ;;  %v516_v63 = vpop.f32.mrb[13].mxu0 }
 0x198   : > { %741 = vst [vmem:[%s2291_s29 + $0x68] sm:$0xff] %v1403_v62  ;;  %v547_v0 = vmul.f32 0.70710677, %v516_v63  ;;  %v709_v1 = vpop.f32.mrb[13].mxu1 }
 0x199   : > { %564 = vst [vmem:[%s2295_s7 + $0x68] sm:$0xff] %v548_v61  ;;  %740 = vst [vmem:[%s2291_s29 + $0x60] sm:$0xff] %v709_v1 }
 0x19a   : > { %563 = vst [vmem:[%s2295_s7 + $0x60] sm:$0xff] %v547_v0  ;;  %v1350_v2 = vpop.f32.mrb[14].mxu0 }
 0x19b   : > { %v550_v3 = vmul.f32 0.70710677, %v1350_v2  ;;  %v1406_v4 = vpop.f32.mrb[14].mxu1  ;;  %v526_v5 = vpop.f32.mrb[15].mxu0 }
 0x19c   : > { %743 = vst [vmem:[%s2291_s29 + $0x78] sm:$0xff] %v1406_v4  ;;  %v549_v6 = vmul.f32 0.70710677, %v526_v5  ;;  %v719_v7 = vpop.f32.mrb[15].mxu1 }
 0x19d   : > { %566 = vst [vmem:[%s2295_s7 + $0x78] sm:$0xff] %v550_v3  ;;  %742 = vst [vmem:[%s2291_s29 + $0x70] sm:$0xff] %v719_v7 }
 0x19e   : > { %565 = vst [vmem:[%s2295_s7 + $0x70] sm:$0xff] %v549_v6  ;;  %v1441_v8 = vpop.f32.mrb[16].mxu0 }
 0x19f   : > { %1809 = shalt.err (!%p1806_p8)
}
 0x1a0   : > { %s1810_s29 = scalar_lea.hbm %s2334_s30, 2048  ;;  %s1814_s24 = scalar_lea.hbm %s2487_s5, 4096 }
 0x1a1   : > { %p1811_p12 = scmp.ne.s32.totalorder %s2334_s30, %s1810_s29  ;;  %p1815_p13 = scmp.lt.u32.totalorder %s2334_s30, %s2487_s5 }
 0x1a2   : > { %p1816_p6 = scmp.lt.u32.totalorder %s1814_s24, %s1810_s29  ;;  %p1818_p5 = scmp.lt.u32.totalorder %s1810_s29, %s2334_s30 }
 0x1a3   : > { %p1812_p1 = pnand %p1811_p12, %p2152_p10 }
 0x1a4   : > { %p1817_p3 = por %p1816_p6, %p1815_p13 }
 0x1a5   : > { %p1813_p11 = pneg %p1812_p1 }
 0x1a6   : > { %p1819_p7 = por %p1818_p5, %p1817_p3 }
 0x1a8   : > { %p1820_p9 = pnand %p1819_p7, %p1813_p11 }
 0x1aa   : > { %1823 = shalt.err (!%p1820_p9)
}
 0x1ab   : > { %s1955_s21 = smov 128   ;;  %s1956_s12 = smov 8   ;;  %v1453_v9 = vpop.f32.mrb[16].mxu1  ;;  %v826_v10 = vpop.f32.mrb[17].mxu0 }
 0x1ac   : > { %1590 = dma.vmem_to_hbm [thread:$0]  (%p2152_p10), %s2336_s13, 2048, %s2334_s30, %s2350_s11, %s1955_s21, %s1955_s21, %s1956_s12  }
 0x1ad   : > { %s2378_s20 = scalar_lea.vmem [#allocation13], %s2216_s8  ;;  %s922_s29 = scalar_lea.sflag [#allocation4], %s2213_s17 }
 0x1ae   : > { %906 = vst [vmem:[%s2378_s20 + $0x8] sm:$0xff] %v1441_v8  ;;  %s1824_s7 = scalar_lea.vmem %s2345_s27, 2048  ;;  %s1957_s15 = smov [#allocation10]  }
 0x1af   : > { %p1825_p0 = scmp.ne.s32.totalorder %s2345_s27, %s1824_s7  ;;  %s1828_s24 = sshll.u32 %s1957_s15, 4  ;;  %s1829_s24 = int_to_ptr.vmem [resolvable:$false] %s1828_s24 }
 0x1b0   : > { %s1830_s14 = scalar_lea.vmem %s1829_s24, 4096  ;;  %p1831_p8 = scmp.lt.s32.totalorder %s2345_s27, %s1829_s24 }
 0x1b1   : > { %p1826_p2 = pnand %p1825_p0, %p2152_p10  ;;  %p1832_p12 = scmp.lt.s32.totalorder %s1830_s14, %s1824_s7 }
 0x1b3   : > { %p1827_p4 = pneg %p1826_p2  ;;  %p1833_p1 = por %p1832_p12, %p1831_p8 }
 0x1b5   : > { %p1834_p11 = pnand %p1833_p1, %p1827_p4 }
 0x1b7   : > { %1837 = shalt.err (!%p1834_p11)
}
 0x1b8   : > { %s1838_s8 = scalar_lea.hbm %s2343_s18, 2048  ;;  %s1842_s9 = scalar_lea.hbm %s2486_s4, 4096 }
 0x1b9   : > { %p1839_p13 = scmp.ne.s32.totalorder %s2343_s18, %s1838_s8  ;;  %p1843_p5 = scmp.lt.u32.totalorder %s2343_s18, %s2486_s4 }
 0x1ba   : > { %p1844_p7 = scmp.lt.u32.totalorder %s1842_s9, %s1838_s8  ;;  %p1846_p0 = scmp.lt.u32.totalorder %s1838_s8, %s2343_s18 }
 0x1bb   : > { %p1840_p6 = pnand %p1839_p13, %p2152_p10 }
 0x1bc   : > { %p1845_p9 = por %p1844_p7, %p1843_p5 }
 0x1bd   : > { %p1841_p3 = pneg %p1840_p6 }
 0x1be   : > { %p1847_p2 = por %p1846_p0, %p1845_p9 }
 0x1c0   : > { %p1848_p4 = pnand %p1847_p2, %p1841_p3 }
 0x1c2   : > { %1851 = shalt.err (!%p1848_p4)
}
 0x1c3   : > { %1589 = dma.vmem_to_hbm [thread:$0]  (%p2152_p10), %s2345_s27, 2048, %s2343_s18, %s922_s29, %s1955_s21, %s1955_s21, %s1956_s12   ;;  %v866_v11 = vpop.f32.mrb[17].mxu1  ;;  %v1444_v12 = vpop.f32.mrb[18].mxu0 }
 0x1c4   : > { %914 = vst [vmem:[%s2378_s20 + $0x48] sm:$0xff] %v1453_v9  ;;  %905 = vst [vmem:[%s2378_s20] sm:$0xff] %v826_v10  ;;  %v1456_v13 = vpop.f32.mrb[18].mxu1  ;;  %v836_v14 = vpop.f32.mrb[19].mxu0  ;;  %s983_s17 = sshll.u32 %s2378_s20, 4  ;;  %s2425_s29 = scalar_lea.hbm %s2488_s6, %s2322_s16  ;;  %s2427_s17 = int_to_ptr.vmem [resolvable:$true] %s983_s17 }
 0x1c5   : > { %913 = vst [vmem:[%s2378_s20 + $0x40] sm:$0xff] %v866_v11  ;;  %908 = vst [vmem:[%s2378_s20 + $0x18] sm:$0xff] %v1444_v12  ;;  %v876_v15 = vpop.f32.mrb[19].mxu1  ;;  %v1447_v16 = vpop.f32.mrb[20].mxu0  ;;  %s1852_s7 = scalar_lea.vmem %s2427_s17, 2048  ;;  %s1958_s14 = smov [#allocation13]  }
 0x1c6   : > { %916 = vst [vmem:[%s2378_s20 + $0x58] sm:$0xff] %v1456_v13  ;;  %907 = vst [vmem:[%s2378_s20 + $0x10] sm:$0xff] %v836_v14  ;;  %v1459_v17 = vpop.f32.mrb[20].mxu1  ;;  %v846_v18 = vpop.f32.mrb[21].mxu0  ;;  %p1853_p8 = scmp.ne.s32.totalorder %s2427_s17, %s1852_s7  ;;  %s1856_s8 = sshll.u32 %s1958_s14, 4  ;;  %s1857_s8 = int_to_ptr.vmem [resolvable:$false] %s1856_s8 }
 0x1c7   : > { %915 = vst [vmem:[%s2378_s20 + $0x50] sm:$0xff] %v876_v15  ;;  %910 = vst [vmem:[%s2378_s20 + $0x28] sm:$0xff] %v1447_v16  ;;  %v886_v19 = vpop.f32.mrb[21].mxu1  ;;  %v1450_v20 = vpop.f32.mrb[22].mxu0  ;;  %s1858_s13 = scalar_lea.vmem %s1857_s8, 4096  ;;  %p1859_p11 = scmp.lt.s32.totalorder %s2427_s17, %s1857_s8 }
 0x1c8   : > { %918 = vst [vmem:[%s2378_s20 + $0x68] sm:$0xff] %v1459_v17  ;;  %909 = vst [vmem:[%s2378_s20 + $0x20] sm:$0xff] %v846_v18  ;;  %v1462_v21 = vpop.f32.mrb[22].mxu1  ;;  %v856_v22 = vpop.f32.mrb[23].mxu0  ;;  %p1854_p12 = pnand %p1853_p8, %p2152_p10  ;;  %p1860_p13 = scmp.lt.s32.totalorder %s1858_s13, %s1852_s7 }
 0x1c9   : > { %917 = vst [vmem:[%s2378_s20 + $0x60] sm:$0xff] %v886_v19  ;;  %912 = vst [vmem:[%s2378_s20 + $0x38] sm:$0xff] %v1450_v20  ;;  %v896_v23 = vpop.f32.mrb[23].mxu1 }
 0x1ca   : > { %920 = vst [vmem:[%s2378_s20 + $0x78] sm:$0xff] %v1462_v21  ;;  %911 = vst [vmem:[%s2378_s20 + $0x30] sm:$0xff] %v856_v22  ;;  %p1855_p1 = pneg %p1854_p12  ;;  %p1861_p6 = por %p1860_p13, %p1859_p11 }
 0x1cb   : > { %919 = vst [vmem:[%s2378_s20 + $0x70] sm:$0xff] %v896_v23 }
 0x1cc   : > { %p1862_p3 = pnand %p1861_p6, %p1855_p1 }
 0x1ce   : > { %1865 = shalt.err (!%p1862_p3)
}
 0x1cf   : > { %s1866_s16 = scalar_lea.hbm %s2425_s29, 2048  ;;  %s1870_s9 = scalar_lea.hbm %s2488_s6, 4096 }
 0x1d0   : > { %p1867_p5 = scmp.ne.s32.totalorder %s2425_s29, %s1866_s16  ;;  %p1871_p0 = scmp.lt.u32.totalorder %s2425_s29, %s2488_s6 }
 0x1d1   : > { %p1872_p2 = scmp.lt.u32.totalorder %s1870_s9, %s1866_s16  ;;  %p1874_p8 = scmp.lt.u32.totalorder %s1866_s16, %s2425_s29 }
 0x1d2   : > { %p1868_p7 = pnand %p1867_p5, %p2152_p10 }
 0x1d3   : > { %p1873_p4 = por %p1872_p2, %p1871_p0 }
 0x1d4   : > { %p1869_p9 = pneg %p1868_p7 }
 0x1d5   : > { %p1875_p12 = por %p1874_p8, %p1873_p4 }
 0x1d7   : > { %p1876_p1 = pnand %p1875_p12, %p1869_p9 }
 0x1d9   : > { %1879 = shalt.err (!%p1876_p1)
}
 0x1da   : > { %1591 = dma.vmem_to_hbm [thread:$0]  (%p2152_p10), %s2427_s17, 2048, %s2425_s29, %s2350_s11, %s1955_s21, %s1955_s21, %s1956_s12  }
 0x1db PF: > { %s2511_s27 = sld [smem:[#allocation19_spill]]  ;;  %s2512_s18 = sld [smem:[#allocation20_spill]] }
 0x1dc   : > { %p2514_p13 = scmp.ge.s32.totalorder %s1946_s26, 2 }
 0x1e1   : > { %s998_s7 = sand.u32 1, %s2511_s27   ;;  %p2513_p11 = scmp.ne.s32.totalorder %s2512_s18, 0 }
 0x1e2   : > { %s999_s14 = scalar_lea.sflag [#allocation4], %s998_s7 }
 0x1e3   : > { %p1610_p6 = pnand %p2514_p13, %p2513_p11 }
 0x1e5   : > { %1917 = dma.done.wait (!%p1610_p6), %s999_s14, 2048  }
 0x1e6   : > { %1919 = vsyncadd (!%p1610_p6), %s999_s14, 4294965248  ;;  %s2515_s28 = sadd.s32 4294967294, %s1946_s26  }
 0x1e7   : > { %s1007_s8 = sand.u32 1, %s2515_s28  }
 0x1e8   : > { %s1008_s13 = scalar_lea.sflag [#allocation12], %s1007_s8 }
 0x1e9   : > { %1921 = dma.done.wait (!%p1610_p6), %s1008_s13, 4096  }
 0x1ea   : > { %1923 = vsyncadd (!%p1610_p6), %s1008_s13, 4294963200  ;;  %s28_s26 = sadd.s32 1, %s1946_s26   ;;  %s2516_s21 = smov %s1930_s22 }
 0x1eb   : > { %p25_p10 = scmp.ge.s32.totalorder %s28_s26, 4   ;;  %s2517_s22 = smov %s1934_s23 }
 0x1ec   : > { %s2518_s23 = smov %s2164_s19  ;;  %s2519_s24 = smov %s1942_s25 }
 0x1ed   : > { %s2520_s25 = smov %s2522_s10  ;;  %27 = sbr.rel (!%p25_p10) target bundleno = 10 (0xa), region = 125 }
 0x1f4   :  { %1022 = vsyncpa [#allocation3], 1 }
 0x1f5   :  { %1024 = vsyncpa [#allocation3 + $0x1], 1 }
 0x1f6   :  { %1025 = vsyncpa [#allocation6], 1 }
 0x1f7   :  { %1026 = vsyncpa [#allocation9], 1 }
 0x1f8   :  { %1027 = vsyncpa [#allocation4], 1 }
 0x1f9   :  { %1029 = vsyncpa [#allocation4 + $0x1], 1 }
 0x1fa   :  { %1030 = vsyncpa [#allocation12], 1 }
 0x1fb   :  { %1032 = vsyncpa [#allocation12 + $0x1], 1 }

</bundles_post_ra>
